<compile_context>
chip_gen: v7x
topology: tpu7x:2x2x1
jax: 0.10.0
libtpu: 0.0.40
codegen_flags: <defaults>
</compile_context>

<pallas_src>
import jax
import jax.numpy as jnp
from jax.experimental import pallas as pl
from jax.experimental.pallas import tpu as pltpu


# --------------------------------------------------------------------------
# Stage 1: BatchNorm1d + fused (theta | out) linear.  Small, gridless.
# --------------------------------------------------------------------------
def bn_linear_kernel(h_ref, wcat_ref, bcat_ref, hx_ref, outp_ref):
    H = h_ref[...].astype(jnp.float32)
    n = H.shape[0]

    # One-pass biased batch stats (BatchNorm1d training mode, gamma=1, beta=0).
    s = jnp.sum(H, axis=0, keepdims=True)
    ss = jnp.sum(H * H, axis=0, keepdims=True)
    mean = s * (1.0 / n)
    var = ss * (1.0 / n) - mean * mean
    Hn = (H - mean) * jax.lax.rsqrt(var + 1e-5)

    # Single fused matmul on the MXU (bf16 inputs, f32 accumulation).
    y = jnp.dot(Hn.astype(jnp.bfloat16), wcat_ref[...],
                preferred_element_type=jnp.float32) + bcat_ref[...]

    d_theta = hx_ref.shape[1]
    hx_ref[...] = y[:, :d_theta].astype(hx_ref.dtype)        # [N, 128]
    outp_ref[...] = y[:, d_theta:].astype(outp_ref.dtype)    # [N, D_out_pad]


# --------------------------------------------------------------------------
# Stage 2: row-block-tiled attention + softmax + aggregation + LeakyReLU.
# --------------------------------------------------------------------------
def attn_kernel(lam_ref, hx_ref, outp_ref, mask_ref, o_ref, a_ref):
    i = pl.program_id(0)
    tm, n = mask_ref.shape

    # Row block of Hx for this tile (sublane-aligned dynamic slice).
    row_start = pl.multiple_of(i * tm, tm)
    hx_rows = hx_ref[pl.ds(row_start, tm), :]                 # (tm, 128) bf16

    # e = sigmoid(Hx_rows @ Hx.T) without an explicit transpose:
    # contract dim 1 of both operands directly on the MXU.
    scores = jax.lax.dot_general(
        hx_rows, hx_ref[...],
        dimension_numbers=(((1,), (1,)), ((), ())),
        preferred_element_type=jnp.float32)                   # (tm, n) f32
    e = jax.nn.sigmoid(scores)

    neg = jnp.float32(-9e15)
    A = jnp.where(mask_ref[...] > 0.0, e, neg)

    # lambda_ * I, applied only on this tile's diagonal entries (no dense eye).
    rows = jax.lax.broadcasted_iota(jnp.int32, (tm, n), 0) + i * tm
    cols = jax.lax.broadcasted_iota(jnp.int32, (tm, n), 1)
    lam = lam_ref[0, 0]
    A = jnp.where(rows == cols, A + lam, A)
    a_ref[...] = A

    # Row-wise softmax (dim=1) in f32; reciprocal on the EUP.
    A_max = jnp.max(A, axis=1, keepdims=True)
    A_exp = jnp.exp(A - A_max)
    inv_sum = pl.reciprocal(jnp.sum(A_exp, axis=1, keepdims=True), approx=True)
    A_sm = A_exp * inv_sum

    # Aggregate (bf16 MXU, f32 acc) + LeakyReLU(0.01).
    o = jnp.dot(A_sm.astype(jnp.bfloat16), outp_ref[...],
                preferred_element_type=jnp.float32)           # (tm, D_out_pad)
    o_ref[...] = jnp.where(o >= 0.0, o, 0.01 * o)


# --------------------------------------------------------------------------
# Wrapper
# --------------------------------------------------------------------------
def _pick_tm(n, d_theta, d_out_pad):
    """Row-tile size keeping the per-step working set well under the 32 MiB
    scoped-VMEM default (so it fits v7x / v6e / v5e without raising limits)."""
    resident = 2 * 2 * n * (d_theta + d_out_pad) * 2  # double-buffered bf16 slabs
    budget = max(4 * 1024 * 1024, 28 * 1024 * 1024 - resident)
    tm = budget // (n * 4 * 8)                         # ~8 live f32 (tm, n) slabs
    tm = int(max(8, min(512, (tm // 8) * 8, n)))
    while n % tm != 0:
        tm -= 8
    return tm


def gcn_layer_pyg(H, w_theta, b_theta, w_out, b_out, mask, lam, *, tm=None):
    N, d_in = H.shape
    d_theta = w_theta.shape[1]          # 128 by module definition
    d_out = w_out.shape[1]
    assert N % 8 == 0, "node count must be a multiple of 8 (sublane tiling)"
    d_out_pad = ((d_out + 127) // 128) * 128

    # Fused, lane-padded weights/bias: [d_in, d_theta + d_out_pad].
    w_cat = jnp.zeros((d_in, d_theta + d_out_pad), jnp.bfloat16)
    w_cat = w_cat.at[:, :d_theta].set(w_theta.astype(jnp.bfloat16))
    w_cat = w_cat.at[:, d_theta:d_theta + d_out].set(w_out.astype(jnp.bfloat16))
    b_cat = jnp.zeros((1, d_theta + d_out_pad), jnp.float32)
    b_cat = b_cat.at[:, :d_theta].set(b_theta.reshape(1, -1).astype(jnp.float32))
    b_cat = b_cat.at[:, d_theta:d_theta + d_out].set(
        b_out.reshape(1, -1).astype(jnp.float32))

    vmem = pl.BlockSpec(memory_space=pltpu.MemorySpace.VMEM)

    # ---- Stage 1: BN + fused linear (prologue, whole problem fits VMEM) ----
    hx, outp = pl.pallas_call(
        bn_linear_kernel,
        out_shape=(jax.ShapeDtypeStruct((N, d_theta), jnp.bfloat16),
                   jax.ShapeDtypeStruct((N, d_out_pad), jnp.bfloat16)),
        in_specs=[vmem, vmem, vmem],
        out_specs=(vmem, vmem),
    )(H, w_cat, b_cat)

    # ---- Stage 2: row-block tiled attention stage ----
    if tm is None:
        tm = _pick_tm(N, d_theta, d_out_pad)
    tm = min(tm, N)
    while N % tm != 0:
        tm -= 8
    grid = (N // tm,)

    mask_bf16 = mask.astype(jnp.bfloat16)   # 0/1 exactly representable
    lam2d = jnp.asarray(lam, jnp.float32).reshape(1, 1)

    out_pad, A = pl.pallas_call(
        attn_kernel,
        out_shape=(jax.ShapeDtypeStruct((N, d_out_pad), jnp.float32),
                   jax.ShapeDtypeStruct((N, N), jnp.float32)),
        grid_spec=pltpu.PrefetchScalarGridSpec(
            num_scalar_prefetch=0,
            grid=grid,
            in_specs=[
                pl.BlockSpec((1, 1), lambda i: (0, 0),
                             memory_space=pltpu.MemorySpace.SMEM),   # lambda_
                pl.BlockSpec((N, d_theta), lambda i: (0, 0)),        # Hx (resident)
                pl.BlockSpec((N, d_out_pad), lambda i: (0, 0)),      # out slab (resident)
                pl.BlockSpec((tm, N), lambda i: (i, 0)),             # mask row block
            ],
            out_specs=(
                pl.BlockSpec((tm, d_out_pad), lambda i: (i, 0)),     # o row block
                pl.BlockSpec((tm, N), lambda i: (i, 0)),             # A row block
            ),
        ),
        compiler_params=pltpu.CompilerParams(
            dimension_semantics=("parallel",)),                      # v7x megacore
    )(lam2d, hx, outp, mask_bf16)

    return out_pad[:, :d_out], A


if __name__ == "__main__":
    N = 256        # node count
    D_IN = 32      # input_dim
    D_OUT = 16     # output_dim
    D_THETA = 128  # fixed by GCN_liner_theta_1

    key = jax.random.PRNGKey(0)
    k_h, k_adj, k_wt, k_bt, k_wo, k_bo = jax.random.split(key, 6)

    # input features
    H = jax.random.normal(k_h, (N, D_IN), dtype=jnp.float32)

    # dense adjacency (0/1), mask = ceil(adj * 1e-5) as in __init__
    adj = (jax.random.uniform(k_adj, (N, N)) < 0.05).astype(jnp.float32)
    adj = jnp.maximum(adj, adj.T)  # symmetrize
    mask = jnp.ceil(adj * 1e-5)

    # deterministic parameter init (shapes from the module's __init__)
    w_theta = jax.random.normal(k_wt, (D_IN, D_THETA), dtype=jnp.float32) * 0.05
    b_theta = jax.random.normal(k_bt, (1, D_THETA), dtype=jnp.float32) * 0.05
    w_out = jax.random.normal(k_wo, (D_IN, D_OUT), dtype=jnp.float32) * 0.05
    b_out = jax.random.normal(k_bo, (1, D_OUT), dtype=jnp.float32) * 0.05
    lam = jnp.zeros((1, 1), dtype=jnp.float32)  # nn.Parameter(torch.zeros(1))

    out, A = gcn_layer_pyg(H, w_theta, b_theta, w_out, b_out, mask, lam, tm=128)
    jax.block_until_ready((out, A))

    assert out.shape == (N, D_OUT) and A.shape == (N, N)
    assert bool(jnp.all(jnp.isfinite(out)))
    assert bool(jnp.all(jnp.isfinite(A[mask > 0])))
    print("KERNEL_OK")
</pallas_src>

<mosaic_0001>
module attributes {stable_mosaic.version = 11 : i64} {
  func.func @bn_linear_kernel(%arg0: memref<256x32xf32, #tpu.memory_space<vmem>>, %arg1: memref<32x256xbf16, #tpu.memory_space<vmem>>, %arg2: memref<1x256xf32, #tpu.memory_space<vmem>>, %arg3: memref<256x128xbf16, #tpu.memory_space<vmem>>, %arg4: memref<256x128xbf16, #tpu.memory_space<vmem>>) attributes {dimension_semantics = [], scalar_prefetch = 0 : i64, scratch_operands = 0 : i64, tpu.core_type = #tpu.core_type<tc>} {
    %c0 = arith.constant 0 : index
    %c0_0 = arith.constant 0 : index
    %0 = vector.load %arg0[%c0, %c0_0] : memref<256x32xf32, #tpu.memory_space<vmem>>, vector<256x32xf32>
    %cst = arith.constant dense<0.000000e+00> : vector<32xf32>
    %1 = vector.multi_reduction <add>, %0, %cst [0] : vector<256x32xf32> to vector<32xf32>
    %2 = vector.shape_cast %1 : vector<32xf32> to vector<1x32xf32>
    %3 = arith.mulf %0, %0 : vector<256x32xf32>
    %cst_1 = arith.constant dense<0.000000e+00> : vector<32xf32>
    %4 = vector.multi_reduction <add>, %3, %cst_1 [0] : vector<256x32xf32> to vector<32xf32>
    %5 = vector.shape_cast %4 : vector<32xf32> to vector<1x32xf32>
    %cst_2 = arith.constant 3.906250e-03 : f32
    %6 = vector.broadcast %cst_2 : f32 to vector<1x32xf32>
    %7 = arith.mulf %2, %6 : vector<1x32xf32>
    %cst_3 = arith.constant 3.906250e-03 : f32
    %8 = vector.broadcast %cst_3 : f32 to vector<1x32xf32>
    %9 = arith.mulf %5, %8 : vector<1x32xf32>
    %10 = arith.mulf %7, %7 : vector<1x32xf32>
    %11 = arith.subf %9, %10 : vector<1x32xf32>
    %12 = vector.broadcast %7 : vector<1x32xf32> to vector<256x32xf32>
    %13 = arith.subf %0, %12 : vector<256x32xf32>
    %cst_4 = arith.constant 9.99999974E-6 : f32
    %14 = vector.broadcast %cst_4 : f32 to vector<1x32xf32>
    %15 = arith.addf %11, %14 : vector<1x32xf32>
    %16 = math.rsqrt %15 : vector<1x32xf32>
    %17 = vector.broadcast %16 : vector<1x32xf32> to vector<256x32xf32>
    %18 = arith.mulf %13, %17 : vector<256x32xf32>
    %19 = arith.truncf %18 : vector<256x32xf32> to vector<256x32xbf16>
    %c0_5 = arith.constant 0 : index
    %c0_6 = arith.constant 0 : index
    %20 = vector.load %arg1[%c0_5, %c0_6] : memref<32x256xbf16, #tpu.memory_space<vmem>>, vector<32x256xbf16>
    %cst_7 = arith.constant dense<0.000000e+00> : vector<256x256xf32>
    %21 = tpu.matmul %19, %20, %cst_7 {dimension_numbers = #tpu.dot_dimension_numbers<[1], [0], [0], [1], [0, 0, 1, 1], [], []>} : vector<256x32xbf16>, vector<32x256xbf16>, vector<256x256xf32> -> vector<256x256xf32>
    %c0_8 = arith.constant 0 : index
    %c0_9 = arith.constant 0 : index
    %22 = vector.load %arg2[%c0_8, %c0_9] : memref<1x256xf32, #tpu.memory_space<vmem>>, vector<1x256xf32>
    %23 = vector.broadcast %22 : vector<1x256xf32> to vector<256x256xf32>
    %24 = arith.addf %21, %23 : vector<256x256xf32>
    %25 = vector.extract_strided_slice %24 {offsets = [0, 0], sizes = [256, 128], strides = [1, 1]} : vector<256x256xf32> to vector<256x128xf32>
    %26 = arith.truncf %25 : vector<256x128xf32> to vector<256x128xbf16>
    %c0_10 = arith.constant 0 : index
    %c0_11 = arith.constant 0 : index
    %27 = vector.load %arg3[%c0_10, %c0_11] : memref<256x128xbf16, #tpu.memory_space<vmem>>, vector<256x128xbf16>
    tpu.vector_store %arg3[%c0_10, %c0_11], %26 {strides = array<i32>} : memref<256x128xbf16, #tpu.memory_space<vmem>>, vector<256x128xbf16>,
    %28 = vector.extract_strided_slice %24 {offsets = [0, 128], sizes = [256, 128], strides = [1, 1]} : vector<256x256xf32> to vector<256x128xf32>
    %29 = arith.truncf %28 : vector<256x128xf32> to vector<256x128xbf16>
    %c0_12 = arith.constant 0 : index
    %c0_13 = arith.constant 0 : index
    %30 = vector.load %arg4[%c0_12, %c0_13] : memref<256x128xbf16, #tpu.memory_space<vmem>>, vector<256x128xbf16>
    tpu.vector_store %arg4[%c0_12, %c0_13], %29 {strides = array<i32>} : memref<256x128xbf16, #tpu.memory_space<vmem>>, vector<256x128xbf16>,
    return
  }
}

</mosaic_0001>

<bundles_post_ra>
// kernel: tpu_custom_call.1
= control target key start
LH: loop header
LB: loop body
LE: loop exit
PB: predicated region body
PF: predicated region fallthrough
CT: control target
= control target key end

     0   :  { %10 = vsyncpa [#allocation3], 0  ;;  %vm51_vm0 = vcmask 261120   ;;  %v1340_v2 = vmov 0   ;;  %s1956_s0 = inlined_call_operand.vmem [shape: f32[256,32], index: 0, kind: input, shape index: {}]   ;;  %s1957_s1 = inlined_call_operand.vmem [shape: bf16[32,256], index: 1, kind: input, shape index: {}]   ;;  %s1958_s2 = inlined_call_operand.vmem [shape: f32[1,256], index: 2, kind: input, shape index: {}]   ;;  %s1959_s3 = inlined_call_operand.hbm [shape: bf16[256,128], index: 3, kind: output, shape index: {0}]   ;;  %s1960_s4 = inlined_call_operand.hbm [shape: bf16[256,128], index: 4, kind: output, shape index: {1}]  }
   0x1   :  { %v1284_v0 = vld [vmem:[%s1957_s1 + $0x4] ss:$8 sps:$4 sm:$0xff]   ;;  %v1286_v1 = vld [vmem:[%s1957_s1] ss:$8 sps:$4 sm:$0xff]   ;;  %424 = vmatprep.mubr.bf16.mxu0 %v1340_v2  ;;  %504 = vmatprep.mubr.bf16.mxu1 %v1340_v2  ;;  %v1287_v3 = vld [vmem:[%s1957_s1 + $0x14] ss:$8 sps:$4 sm:$0xff]  }
   0x2   :  { %392 = vmatprep.subr.bf16.mxu0 %v1284_v0  ;;  %1275 = vmatprep.subr.bf16.mxu1 %v1284_v0  ;;  %v1289_v4 = vld [vmem:[%s1957_s1 + $0x10] ss:$8 sps:$4 sm:$0xff]   ;;  %v1387_v5 = vld [vmem:[%s1956_s0] sm:$0xff]  ;;  %v1392_v6 = vld [vmem:[%s1956_s0 + $0x8] sm:$0xff] }
   0x3   :  { %393 = vmatpush1.bf16.msra.mxu0 %v1286_v1  ;;  %1277 = vmatpush1.bf16.msra.mxu1 %v1286_v1  ;;  %v1397_v7 = vld [vmem:[%s1956_s0 + $0x10] sm:$0xff]  ;;  %v1402_v8 = vld [vmem:[%s1956_s0 + $0x18] sm:$0xff]  ;;  %v52_v9 = vsel %vm51_vm0, %v1387_v5, 0.0  ;;  %v53_v10 = vsel %vm51_vm0, %v1392_v6, 0.0  ;;  %v1413_v12 = vld [vmem:[%s1956_s0 + $0x20] sm:$0xff] }
   0x4   :  { %394 = vmatprep.subr.bf16.mxu0 %v1287_v3  ;;  %1276 = vmatprep.subr.bf16.mxu1 %v1287_v3  ;;  %v55_v11 = vsel %vm51_vm0, %v1397_v7, 0.0  ;;  %v54_v13 = vadd.f32 %v53_v10, %v52_v9  ;;  %v57_v14 = vsel %vm51_vm0, %v1402_v8, 0.0  ;;  %v1420_v15 = vld [vmem:[%s1956_s0 + $0x28] sm:$0xff]  ;;  %v59_v17 = vsel %vm51_vm0, %v1413_v12, 0.0  ;;  %v1427_v18 = vld [vmem:[%s1956_s0 + $0x30] sm:$0xff]  ;;  %v1434_v21 = vld [vmem:[%s1956_s0 + $0x38] sm:$0xff] }
   0x5   :  { %v61_v20 = vsel %vm51_vm0, %v1420_v15, 0.0  ;;  %v63_v23 = vsel %vm51_vm0, %v1427_v18, 0.0  ;;  %v1441_v24 = vld [vmem:[%s1956_s0 + $0x40] sm:$0xff] }
   0x6   :  { %v56_v16 = vadd.f32 %v55_v11, %v54_v13 }
   0x7   :  { %395 = vmatpush1.bf16.msra.mxu0 %v1289_v4  ;;  %1278 = vmatpush1.bf16.msra.mxu1 %v1289_v4 }
   0x8   :  { %v58_v19 = vadd.f32 %v57_v14, %v56_v16 }
   0xa   :  { %v60_v22 = vadd.f32 %v59_v17, %v58_v19 }
   0xc   :  { %v62_v25 = vadd.f32 %v61_v20, %v60_v22 }
   0xd   :  { %11 = vsyncpa [#allocation5], 0  ;;  %v65_v26 = vsel %vm51_vm0, %v1434_v21, 0.0  ;;  %v1448_v27 = vld [vmem:[%s1956_s0 + $0x48] sm:$0xff]  ;;  %v67_v29 = vsel %vm51_vm0, %v1441_v24, 0.0  ;;  %v1455_v30 = vld [vmem:[%s1956_s0 + $0x50] sm:$0xff]  ;;  %v121_v32 = vmul.f32 %v1387_v5, %v1387_v5  ;;  %v122_v34 = vmul.f32 %v1392_v6, %v1392_v6 }
   0xe   :  { %v64_v28 = vadd.f32 %v63_v23, %v62_v25  ;;  %v69_v33 = vsel %vm51_vm0, %v1448_v27, 0.0  ;;  %v123_v35 = vmul.f32 %v1397_v7, %v1397_v7  ;;  %v1468_v36 = vld [vmem:[%s1956_s0 + $0x58] sm:$0xff]  ;;  %v71_v38 = vsel %vm51_vm0, %v1455_v30, 0.0  ;;  %v1477_v40 = vld [vmem:[%s1956_s0 + $0x60] sm:$0xff]  ;;  %v1489_v47 = vld [vmem:[%s1956_s0 + $0x68] sm:$0xff]  ;;  %s1342_s8 = smov [#allocation4]  }
   0xf   :  { %v124_v39 = vmul.f32 %v1402_v8, %v1402_v8  ;;  %v153_v42 = vsel %vm51_vm0, %v121_v32, 0.0  ;;  %v73_v43 = vsel %vm51_vm0, %v1468_v36, 0.0  ;;  %v125_v44 = vmul.f32 %v1413_v12, %v1413_v12  ;;  %v1499_v53 = vld [vmem:[%s1956_s0 + $0x70] sm:$0xff]  ;;  %v1509_v59 = vld [vmem:[%s1956_s0 + $0x78] sm:$0xff]  ;;  %v1519_v1 = vld [vmem:[%s1956_s0 + $0x80] sm:$0xff]  ;;  %s922_s9 = sshll.u32 %s1342_s8, 4  ;;  %s1925_s9 = int_to_ptr.vmem [resolvable:$true] %s922_s9 }
  0x10   :  { %v66_v31 = vadd.f32 %v65_v26, %v64_v28  ;;  %v154_v45 = vsel %vm51_vm0, %v122_v34, 0.0  ;;  %v156_v46 = vsel %vm51_vm0, %v123_v35, 0.0  ;;  %v75_v50 = vsel %vm51_vm0, %v1477_v40, 0.0  ;;  %v1529_v13 = vld [vmem:[%s1956_s0 + $0x88] sm:$0xff]  ;;  %v1539_v22 = vld [vmem:[%s1956_s0 + $0x90] sm:$0xff] }
  0x11   :  { %v155_v49 = vadd.f32 %v154_v45, %v153_v42  ;;  %v126_v51 = vmul.f32 %v1420_v15, %v1420_v15  ;;  %v158_v52 = vsel %vm51_vm0, %v124_v39, 0.0  ;;  %v77_v56 = vsel %vm51_vm0, %v1489_v47, 0.0  ;;  %v1569_v45 = vld [vmem:[%s1956_s0 + $0xa8] sm:$0xff] }
  0x12   :  { %v68_v37 = vadd.f32 %v67_v29, %v66_v31  ;;  %v127_v57 = vmul.f32 %v1427_v18, %v1427_v18  ;;  %v160_v58 = vsel %vm51_vm0, %v125_v44, 0.0  ;;  %v79_v62 = vsel %vm51_vm0, %v1499_v53, 0.0  ;;  %v1549_v31 = vld [vmem:[%s1956_s0 + $0x98] sm:$0xff] }
  0x13   :  { %v157_v55 = vadd.f32 %v156_v46, %v155_v49  ;;  %v128_v63 = vmul.f32 %v1434_v21, %v1434_v21  ;;  %v162_v0 = vsel %vm51_vm0, %v126_v51, 0.0  ;;  %v81_v9 = vsel %vm51_vm0, %v1509_v59, 0.0 }
  0x14   :  { %v70_v41 = vadd.f32 %v69_v33, %v68_v37  ;;  %v129_v10 = vmul.f32 %v1441_v24, %v1441_v24  ;;  %v164_v11 = vsel %vm51_vm0, %v127_v57, 0.0  ;;  %v83_v17 = vsel %vm51_vm0, %v1519_v1, 0.0 }
  0x15   :  { %v159_v61 = vadd.f32 %v158_v52, %v157_v55  ;;  %v130_v19 = vmul.f32 %v1448_v27, %v1448_v27  ;;  %v166_v20 = vsel %vm51_vm0, %v128_v63, 0.0  ;;  %v85_v26 = vsel %vm51_vm0, %v1529_v13, 0.0  ;;  %v1579_v52 = vld [vmem:[%s1956_s0 + $0xb0] sm:$0xff] }
  0x16   :  { %v72_v48 = vadd.f32 %v71_v38, %v70_v41  ;;  %v131_v28 = vmul.f32 %v1455_v30, %v1455_v30  ;;  %v168_v29 = vsel %vm51_vm0, %v129_v10, 0.0  ;;  %v87_v34 = vsel %vm51_vm0, %v1539_v22, 0.0  ;;  %v1559_v38 = vld [vmem:[%s1956_s0 + $0xa0] sm:$0xff] }
  0x17   :  { %v161_v4 = vadd.f32 %v160_v58, %v159_v61  ;;  %v132_v35 = vmul.f32 %v1468_v36, %v1468_v36  ;;  %v170_v37 = vsel %vm51_vm0, %v130_v19, 0.0  ;;  %v89_v42 = vsel %vm51_vm0, %v1549_v31, 0.0 }
  0x18   :  { %v74_v54 = vadd.f32 %v73_v43, %v72_v48  ;;  %v133_v43 = vmul.f32 %v1477_v40, %v1477_v40  ;;  %v172_v44 = vsel %vm51_vm0, %v131_v28, 0.0  ;;  %v91_v49 = vsel %vm51_vm0, %v1559_v38, 0.0  ;;  %v1619_v28 = vld [vmem:[%s1956_s0 + $0xd0] sm:$0xff] }
  0x19   :  { %v163_v16 = vadd.f32 %v162_v0, %v161_v4  ;;  %v174_v51 = vsel %vm51_vm0, %v132_v35, 0.0  ;;  %v135_v57 = vmul.f32 %v1499_v53, %v1499_v53  ;;  %v95_v63 = vsel %vm51_vm0, %v1579_v52, 0.0  ;;  %v1599_v4 = vld [vmem:[%s1956_s0 + $0xc0] sm:$0xff] }
  0x1a   :  { %v76_v60 = vadd.f32 %v75_v50, %v74_v54  ;;  %v134_v50 = vmul.f32 %v1489_v47, %v1489_v47  ;;  %v176_v58 = vsel %vm51_vm0, %v133_v43, 0.0  ;;  %v136_v0 = vmul.f32 %v1509_v59, %v1509_v59 }
  0x1b   :  { %v165_v25 = vadd.f32 %v164_v11, %v163_v16  ;;  %v180_v16 = vsel %vm51_vm0, %v135_v57, 0.0  ;;  %v140_v43 = vmul.f32 %v1549_v31, %v1549_v31 }
  0x1c   :  { %v78_v3 = vadd.f32 %v77_v56, %v76_v60  ;;  %v93_v56 = vsel %vm51_vm0, %v1569_v45, 0.0  ;;  %v1589_v60 = vld [vmem:[%s1956_s0 + $0xb8] sm:$0xff] }
  0x1d   :  { %v167_v33 = vadd.f32 %v166_v20, %v165_v25  ;;  %v97_v11 = vsel %vm51_vm0, %v1589_v60, 0.0  ;;  %v138_v25 = vmul.f32 %v1529_v13, %v1529_v13 }
  0x1e   :  { %v80_v14 = vadd.f32 %v79_v62, %v78_v3  ;;  %v178_v3 = vsel %vm51_vm0, %v134_v50, 0.0 }
  0x1f   :  { %v169_v41 = vadd.f32 %v168_v29, %v167_v33 }
  0x20   :  { %v82_v23 = vadd.f32 %v81_v9, %v80_v14  ;;  %v137_v14 = vmul.f32 %v1519_v1, %v1519_v1 }
  0x21   :  { %v171_v48 = vadd.f32 %v170_v37, %v169_v41  ;;  %v1629_v37 = vld [vmem:[%s1956_s0 + $0xd8] sm:$0xff] }
  0x22   :  { %v84_v32 = vadd.f32 %v83_v17, %v82_v23  ;;  %v1609_v17 = vld [vmem:[%s1956_s0 + $0xc8] sm:$0xff]  ;;  %v99_v23 = vsel %vm51_vm0, %v1599_v4, 0.0  ;;  %v184_v35 = vsel %vm51_vm0, %v137_v14, 0.0  ;;  %v105_v50 = vsel %vm51_vm0, %v1629_v37, 0.0  ;;  %v1669_v14 = vld [vmem:[%s1956_s0 + $0xf8] sm:$0xff] }
  0x23   :  { %v173_v55 = vadd.f32 %v172_v44, %v171_v48  ;;  %v101_v33 = vsel %vm51_vm0, %v1609_v17, 0.0  ;;  %v186_v44 = vsel %vm51_vm0, %v138_v25, 0.0 }
  0x24   :  { %v86_v39 = vadd.f32 %v85_v26, %v84_v32  ;;  %v182_v26 = vsel %vm51_vm0, %v136_v0, 0.0 }
  0x25   :  { %v175_v62 = vadd.f32 %v174_v51, %v173_v55  ;;  %v141_v51 = vmul.f32 %v1559_v38, %v1559_v38  ;;  %v1649_v55 = vld [vmem:[%s1956_s0 + $0xe8] sm:$0xff] }
  0x26   :  { %v88_v46 = vadd.f32 %v87_v34, %v86_v39  ;;  %v139_v34 = vmul.f32 %v1539_v22, %v1539_v22 }
  0x27   :  { %v177_v10 = vadd.f32 %v176_v58, %v175_v62  ;;  %v190_v62 = vsel %vm51_vm0, %v140_v43, 0.0 }
  0x28   :  { %v90_v54 = vadd.f32 %v89_v42, %v88_v46  ;;  %v103_v42 = vsel %vm51_vm0, %v1619_v28, 0.0  ;;  %v1639_v46 = vld [vmem:[%s1956_s0 + $0xe0] sm:$0xff] }
  0x29   :  { %v179_v20 = vadd.f32 %v178_v3, %v177_v10  ;;  %v107_v58 = vsel %vm51_vm0, %v1639_v46, 0.0  ;;  %v143_v10 = vmul.f32 %v1579_v52, %v1579_v52 }
  0x2a   :  { %v92_v61 = vadd.f32 %v91_v49, %v90_v54  ;;  %v188_v54 = vsel %vm51_vm0, %v139_v34, 0.0 }
  0x2b   :  { %v181_v32 = vadd.f32 %v180_v16, %v179_v20  ;;  %v196_v34 = vsel %vm51_vm0, %v143_v10, 0.0 }
  0x2c   :  { %v94_v9 = vadd.f32 %v93_v56, %v92_v61  ;;  %v142_v61 = vmul.f32 %v1569_v45, %v1569_v45 }
  0x2d   :  { %v183_v41 = vadd.f32 %v182_v26, %v181_v32  ;;  %v113_v32 = vsel %vm51_vm0, %v1669_v14, 0.0 }
  0x2e   :  { %v96_v19 = vadd.f32 %v95_v63, %v94_v9  ;;  %v1659_v63 = vld [vmem:[%s1956_s0 + $0xf0] sm:$0xff]  ;;  %v109_v9 = vsel %vm51_vm0, %v1649_v55, 0.0  ;;  %v194_v25 = vsel %vm51_vm0, %v142_v61, 0.0 }
  0x2f   :  { %v185_v49 = vadd.f32 %v184_v35, %v183_v41  ;;  %v111_v20 = vsel %vm51_vm0, %v1659_v63, 0.0  ;;  %v146_v41 = vmul.f32 %v1609_v17, %v1609_v17 }
  0x30   :  { %v98_v29 = vadd.f32 %v97_v11, %v96_v19  ;;  %v192_v11 = vsel %vm51_vm0, %v141_v51, 0.0 }
  0x31   :  { %v187_v57 = vadd.f32 %v186_v44, %v185_v49 }
  0x32   :  { %v100_v39 = vadd.f32 %v99_v23, %v98_v29  ;;  %v144_v23 = vmul.f32 %v1589_v60, %v1589_v60 }
  0x33   :  { %v189_v3 = vadd.f32 %v188_v54, %v187_v57  ;;  %v148_v54 = vmul.f32 %v1629_v37, %v1629_v37 }
  0x34   :  { %v102_v48 = vadd.f32 %v101_v33, %v100_v39  ;;  %v145_v33 = vmul.f32 %v1599_v4, %v1599_v4 }
  0x35   :  { %v191_v19 = vadd.f32 %v190_v62, %v189_v3  ;;  %v150_v3 = vmul.f32 %v1649_v55, %v1649_v55 }
  0x36   :  { %v104_v56 = vadd.f32 %v103_v42, %v102_v48  ;;  %v198_v42 = vsel %vm51_vm0, %v144_v23, 0.0  ;;  %v147_v48 = vmul.f32 %v1619_v28, %v1619_v28  ;;  %v200_v49 = vsel %vm51_vm0, %v145_v33, 0.0 }
  0x37   :  { %v193_v29 = vadd.f32 %v192_v11, %v191_v19  ;;  %v151_v11 = vmul.f32 %v1659_v63, %v1659_v63  ;;  %v152_v23 = vmul.f32 %v1669_v14, %v1669_v14 }
  0x38   :  { %v106_v0 = vadd.f32 %v105_v50, %v104_v56  ;;  %v202_v56 = vsel %vm51_vm0, %v146_v41, 0.0  ;;  %v204_v61 = vsel %vm51_vm0, %v147_v48, 0.0 }
  0x39   :  { %v195_v39 = vadd.f32 %v194_v25, %v193_v29  ;;  %v210_v25 = vsel %vm51_vm0, %v150_v3, 0.0  ;;  %v212_v29 = vsel %vm51_vm0, %v151_v11, 0.0 }
  0x3a   :  { %v108_v16 = vadd.f32 %v107_v58, %v106_v0  ;;  %v149_v58 = vmul.f32 %v1639_v46, %v1639_v46 }
  0x3b   :  { %v197_v44 = vadd.f32 %v196_v34, %v195_v39  ;;  %v214_v34 = vsel %vm51_vm0, %v152_v23, 0.0 }
  0x3c   :  { %v110_v26 = vadd.f32 %v109_v9, %v108_v16  ;;  %v206_v9 = vsel %vm51_vm0, %v148_v54, 0.0  ;;  %v208_v16 = vsel %vm51_vm0, %v149_v58, 0.0 }
  0x3d   :  { %v199_v51 = vadd.f32 %v198_v42, %v197_v44 }
  0x3e   :  { %v112_v35 = vadd.f32 %v111_v20, %v110_v26 }
  0x3f   :  { %v201_v57 = vadd.f32 %v200_v49, %v199_v51 }
  0x40   :  { %v114_v43 = vadd.f32 %v113_v32, %v112_v35 }
  0x41   :  { %v203_v0 = vadd.f32 %v202_v56, %v201_v57 }
  0x42   :  { %v115_v50 = vrot.slane %v114_v43, 4 }
  0x43   :  { %v205_v10 = vadd.f32 %v204_v61, %v203_v0 }
  0x44   :  { %v116_v62 = vadd.f32 %v115_v50, %v114_v43 }
  0x45   :  { %v207_v20 = vadd.f32 %v206_v9, %v205_v10 }
  0x46   :  { %v117_v19 = vrot.slane %v116_v62, 2 }
  0x47   :  { %v209_v26 = vadd.f32 %v208_v16, %v207_v20 }
  0x48   :  { %v118_v32 = vadd.f32 %v117_v19, %v116_v62 }
  0x49   :  { %v211_v33 = vadd.f32 %v210_v25, %v209_v26 }
  0x4a   :  { %v119_v39 = vrot.slane %v118_v32, 1 }
  0x4b   :  { %v213_v35 = vadd.f32 %v212_v29, %v211_v33 }
  0x4c   :  { %v120_v43 = vadd.f32 %v119_v39, %v118_v32 }
  0x4d   :  { %v215_v41 = vadd.f32 %v214_v34, %v213_v35 }
  0x4e   :  { %v1704_v50 = vmul.f32 0.00390625, %v120_v43 }
  0x4f   :  { %v216_v42 = vrot.slane %v215_v41, 4 }
  0x50   :  { %v224_v56 = vmul.f32 %v1704_v50, %v1704_v50  ;;  %v226_v62 = vsub.f32 %v1387_v5, %v1704_v50  ;;  %v227_v0 = vsub.f32 %v1392_v6, %v1704_v50  ;;  %v242_v3 = vsub.f32 %v1519_v1, %v1704_v50 }
  0x51   :  { %v217_v44 = vadd.f32 %v216_v42, %v215_v41  ;;  %v243_v9 = vsub.f32 %v1529_v13, %v1704_v50  ;;  %v228_v11 = vsub.f32 %v1397_v7, %v1704_v50  ;;  %v229_v16 = vsub.f32 %v1402_v8, %v1704_v50 }
  0x52   :  { %v244_v5 = vsub.f32 %v1539_v22, %v1704_v50  ;;  %v245_v6 = vsub.f32 %v1549_v31, %v1704_v50  ;;  %v240_v26 = vsub.f32 %v1499_v53, %v1704_v50  ;;  %v241_v29 = vsub.f32 %v1509_v59, %v1704_v50 }
  0x53   :  { %v218_v48 = vrot.slane %v217_v44, 2  ;;  %v230_v32 = vsub.f32 %v1413_v12, %v1704_v50  ;;  %v231_v33 = vsub.f32 %v1420_v15, %v1704_v50  ;;  %v256_v34 = vsub.f32 %v1659_v63, %v1704_v50 }
  0x54   :  { %v257_v35 = vsub.f32 %v1669_v14, %v1704_v50  ;;  %v246_v53 = vsub.f32 %v1559_v38, %v1704_v50  ;;  %v247_v59 = vsub.f32 %v1569_v45, %v1704_v50 }
  0x55   :  { %v219_v49 = vadd.f32 %v218_v48, %v217_v44 }
  0x57   :  { %v220_v51 = vrot.slane %v219_v49, 1 }
  0x59   :  { %v221_v54 = vadd.f32 %v220_v51, %v219_v49  ;;  %v232_v49 = vsub.f32 %v1427_v18, %v1704_v50  ;;  %v233_v51 = vsub.f32 %v1434_v21, %v1704_v50 }
  0x5b   :  { %v223_v57 = vmul.f32 0.00390625, %v221_v54 }
  0x5d   :  { %v225_v58 = vsub.f32 %v223_v57, %v224_v56  ;;  %v248_v57 = vsub.f32 %v1579_v52, %v1704_v50  ;;  %v234_v52 = vsub.f32 %v1441_v24, %v1704_v50 }
  0x5f   :  { %v258_v61 = vadd.f32 1e-05, %v225_v58  ;;  %v249_v58 = vsub.f32 %v1589_v60, %v1704_v50  ;;  %v235_v60 = vsub.f32 %v1448_v27, %v1704_v50 }
  0x61   :  { %1290 = vrsqrt.f32 %v258_v61 }
  0x6b   :  { %v1716_v10 = vpop.eup %1290 }
  0x6c   :  { %v260_v19 = vmul.f32 %v1716_v10, %v226_v62  ;;  %v261_v1 = vmul.f32 %v1716_v10, %v227_v0  ;;  %v276_v13 = vmul.f32 %v1716_v10, %v242_v3  ;;  %v277_v20 = vmul.f32 %v1716_v10, %v243_v9 }
  0x6d   :  { %v262_v7 = vmul.f32 %v1716_v10, %v228_v11  ;;  %v263_v8 = vmul.f32 %v1716_v10, %v229_v16  ;;  %v278_v22 = vmul.f32 %v1716_v10, %v244_v5  ;;  %v279_v31 = vmul.f32 %v1716_v10, %v245_v6 }
  0x6e   :  { %v292_v23 = vpack.c.bf16 %v261_v1, %v260_v19  ;;  %v300_v25 = vpack.c.bf16 %v277_v20, %v276_v13  ;;  %v1755_v42 = vmul.f32 %v1716_v10, %v240_v26  ;;  %v1758_v12 = vmul.f32 %v1716_v10, %v241_v29 }
  0x6f   :  { %v293_v39 = vpack.c.bf16 %v263_v8, %v262_v7  ;;  %v301_v41 = vpack.c.bf16 %v279_v31, %v278_v22  ;;  %v264_v15 = vmul.f32 %v1716_v10, %v230_v32  ;;  %v265_v63 = vmul.f32 %v1716_v10, %v231_v33  ;;  %v312_v32 = vld [vmem:[%s1958_s2] sm:$0x3]  ;;  %s1341_s2 = smov [#allocation2]  }
  0x70   :  { %941 = vmatmul.mubr.msk.bf16.vlgmr.msra.gmra.mrb[0].mxu0 %vm51_vm0, %v292_v23  ;;  %949 = vmatmul.mubr.msk.bf16.vlgmr.msra.gmra.mrb[0].mxu1 %vm51_vm0, %v300_v25  ;;  %v1763_v14 = vmul.f32 %v1716_v10, %v256_v34  ;;  %v1766_v43 = vmul.f32 %v1716_v10, %v257_v35  ;;  %v280_v38 = vmul.f32 %v1716_v10, %v246_v53  ;;  %s910_s7 = sshll.u32 %s1341_s2, 4  ;;  %s911_s7 = int_to_ptr.vmem [resolvable:$true] %s910_s7 }
  0x71   :  { %434 = vmatprep.mubr.bf16.mxu0 %v1340_v2  ;;  %514 = vmatprep.mubr.bf16.mxu1 %v1340_v2  ;;  %v281_v45 = vmul.f32 %v1716_v10, %v247_v59  ;;  %v299_v44 = vpack.c.bf16 %v1758_v12, %v1755_v42  ;;  %v294_v54 = vpack.c.bf16 %v265_v63, %v264_v15  ;;  %s1292_s10 = scalar_lea.vmem %s911_s7, 2048  ;;  %p1297_p1 = scmp.lt.s32.totalorder %s911_s7, %s911_s7 }
  0x72   :  { %v307_v48 = vpack.c.bf16 %v1766_v43, %v1763_v14  ;;  %v266_v61 = vmul.f32 %v1716_v10, %v232_v49  ;;  %v267_v62 = vmul.f32 %v1716_v10, %v233_v51  ;;  %v282_v18 = vmul.f32 %v1716_v10, %v248_v57  ;;  %p1293_p0 = scmp.ne.s32.totalorder %s911_s7, %s1292_s10  ;;  %p1298_p2 = scmp.lt.s32.totalorder %s1292_s10, %s1292_s10 }
  0x73   :  { %v302_v56 = vpack.c.bf16 %v281_v45, %v280_v38  ;;  %v283_v21 = vmul.f32 %v1716_v10, %v249_v58  ;;  %v250_v9 = vsub.f32 %v1599_v4, %v1704_v50  ;;  %v251_v11 = vsub.f32 %v1609_v17, %v1704_v50 }
  0x74   :  { %v295_v0 = vpack.c.bf16 %v267_v62, %v266_v61  ;;  %v268_v16 = vmul.f32 %v1716_v10, %v234_v52  ;;  %v269_v5 = vmul.f32 %v1716_v10, %v235_v60  ;;  %v236_v4 = vsub.f32 %v1455_v30, %v1704_v50  ;;  %p1299_p3 = por %p1298_p2, %p1297_p1 }
  0x75   :  { %v303_v3 = vpack.c.bf16 %v283_v21, %v282_v18  ;;  %v284_v24 = vmul.f32 %v1716_v10, %v250_v9  ;;  %v285_v27 = vmul.f32 %v1716_v10, %v251_v11  ;;  %v237_v17 = vsub.f32 %v1468_v36, %v1704_v50 }
  0x76   :  { %v296_v6 = vpack.c.bf16 %v269_v5, %v268_v16  ;;  %v252_v1 = vsub.f32 %v1619_v28, %v1704_v50  ;;  %v253_v13 = vsub.f32 %v1629_v37, %v1704_v50  ;;  %v270_v20 = vmul.f32 %v1716_v10, %v236_v4  ;;  %p1300_p4 = pnand %p1299_p3, %p1293_p0 }
  0x77   :  { %v304_v19 = vpack.c.bf16 %v285_v27, %v284_v24  ;;  %v271_v23 = vmul.f32 %v1716_v10, %v237_v17  ;;  %v238_v28 = vsub.f32 %v1477_v40, %v1704_v50  ;;  %v239_v37 = vsub.f32 %v1489_v47, %v1704_v50 }
  0x78   :  { %942 = vmatmul.mubr.msk.bf16.gmra.mrb[4].mxu0 %vm51_vm0, %v293_v39  ;;  %950 = vmatmul.mubr.msk.bf16.gmra.mrb[4].mxu1 %vm51_vm0, %v301_v41  ;;  %v286_v30 = vmul.f32 %v1716_v10, %v252_v1  ;;  %v287_v36 = vmul.f32 %v1716_v10, %v253_v13  ;;  %v254_v8 = vsub.f32 %v1639_v46, %v1704_v50 }
  0x79   :  { %444 = vmatprep.mubr.bf16.mxu0 %v1340_v2  ;;  %524 = vmatprep.mubr.bf16.mxu1 %v1340_v2  ;;  %v297_v25 = vpack.c.bf16 %v271_v23, %v270_v20  ;;  %v255_v22 = vsub.f32 %v1649_v55, %v1704_v50  ;;  %v272_v31 = vmul.f32 %v1716_v10, %v238_v28  ;;  %v314_v55 = vlaneseq }
  0x7a   :  { %v305_v7 = vpack.c.bf16 %v287_v36, %v286_v30  ;;  %v273_v26 = vmul.f32 %v1716_v10, %v239_v37  ;;  %v288_v40 = vmul.f32 %v1716_v10, %v254_v8 }
  0x7b   :  { %v289_v47 = vmul.f32 %v1716_v10, %v255_v22  ;;  %v315_v50 = vshrl.u32 %v314_v55, 7 }
  0x7c   :  { %v298_v46 = vpack.c.bf16 %v273_v26, %v272_v31 }
  0x7d   :  { %v306_v29 = vpack.c.bf16 %v289_v47, %v288_v40  ;;  %v316_v10 = vsub.s32 0, %v315_v50  ;;  %v320_v33 = vsub.s32 1, %v315_v50 }
  0x7f   :  { %v1857_v34 = vrot.slane %v312_v32, %v316_v10  ;;  %v1859_v39 = vrot.slane %v312_v32, %v320_v33 }
  0x80   :  { %943 = vmatmul.mubr.msk.bf16.gmra.mrb[8].mxu0 %vm51_vm0, %v294_v54  ;;  %951 = vmatmul.mubr.msk.bf16.gmra.mrb[8].mxu1 %vm51_vm0, %v302_v56 }
  0x81   :  { %454 = vmatprep.mubr.bf16.mxu0 %v1340_v2  ;;  %534 = vmatprep.mubr.bf16.mxu1 %v1340_v2 }
  0x88   :  { %944 = vmatmul.mubr.msk.bf16.gmra.mrb[12].mxu0 %vm51_vm0, %v295_v0  ;;  %952 = vmatmul.mubr.msk.bf16.gmra.mrb[12].mxu1 %vm51_vm0, %v303_v3 }
  0x89   :  { %464 = vmatprep.mubr.bf16.mxu0 %v1340_v2  ;;  %544 = vmatprep.mubr.bf16.mxu1 %v1340_v2 }
  0x90   :  { %945 = vmatmul.mubr.msk.bf16.gmra.mrb[16].mxu0 %vm51_vm0, %v296_v6  ;;  %953 = vmatmul.mubr.msk.bf16.gmra.mrb[16].mxu1 %vm51_vm0, %v304_v19 }
  0x91   :  { %474 = vmatprep.mubr.bf16.mxu0 %v1340_v2  ;;  %554 = vmatprep.mubr.bf16.mxu1 %v1340_v2 }
  0x98   :  { %946 = vmatmul.mubr.msk.bf16.gmra.mrb[20].mxu0 %vm51_vm0, %v297_v25  ;;  %954 = vmatmul.mubr.msk.bf16.gmra.mrb[20].mxu1 %vm51_vm0, %v305_v7 }
  0x99   :  { %484 = vmatprep.mubr.bf16.mxu0 %v1340_v2  ;;  %564 = vmatprep.mubr.bf16.mxu1 %v1340_v2 }
  0xa0   :  { %947 = vmatmul.mubr.msk.bf16.gmra.mrb[24].mxu0 %vm51_vm0, %v298_v46  ;;  %955 = vmatmul.mubr.msk.bf16.gmra.mrb[24].mxu1 %vm51_vm0, %v306_v29 }
  0xa1   :  { %494 = vmatprep.mubr.bf16.mxu0 %v1340_v2  ;;  %574 = vmatprep.mubr.bf16.mxu1 %v1340_v2 }
  0xa8   :  { %948 = vmatmul.mubr.msk.bf16.gmra.mrb[28].mxu0 %vm51_vm0, %v299_v44  ;;  %956 = vmatmul.mubr.msk.bf16.gmra.mrb[28].mxu1 %vm51_vm0, %v307_v48 }
 0x143   :  { %v426_v2 = vpop.f32.mrb[0].mxu0  ;;  %v506_v35 = vpop.f32.mrb[0].mxu1 }
 0x144   :  { %v428_v41 = vpop.f32.mrb[1].mxu0  ;;  %v508_v53 = vpop.f32.mrb[1].mxu1  ;;  %v427_v12 = vadd.f32 %v426_v2, %v1857_v34  ;;  %v507_v15 = vadd.f32 %v506_v35, %v1857_v34 }
 0x145   :  { %v430_v59 = vpop.f32.mrb[2].mxu0  ;;  %v510_v42 = vpop.f32.mrb[2].mxu1  ;;  %v429_v45 = vadd.f32 %v428_v41, %v1859_v39  ;;  %v509_v44 = vadd.f32 %v508_v53, %v1859_v39 }
 0x146   :  { %v431_v63 = vadd.f32 %v430_v59, %v1857_v34  ;;  %v511_v14 = vadd.f32 %v510_v42, %v1857_v34  ;;  %v432_v43 = vpop.f32.mrb[3].mxu0  ;;  %v512_v38 = vpop.f32.mrb[3].mxu1 }
 0x147   :  { %v433_v48 = vadd.f32 %v432_v43, %v1859_v39  ;;  %v513_v49 = vadd.f32 %v512_v38, %v1859_v39 }
 0x148   :  { %v1088_v51 = vpack.c.bf16 %v431_v63, %v427_v12  ;;  %v1128_v54 = vpack.c.bf16 %v511_v14, %v507_v15 }
 0x149   :  { %v1168_v56 = vpack.c.bf16 %v433_v48, %v429_v45  ;;  %v1208_v57 = vpack.c.bf16 %v513_v49, %v509_v44 }
 0x14a   :  { %1089 = vst [vmem:[#allocation2] sm:$0xff] %v1088_v51   ;;  %1252 = vst [vmem:[#allocation2 + $0x40] sm:$0xff] %v1128_v54  }
 0x14b   :  { %1169 = vst [vmem:[#allocation4] sm:$0xff] %v1168_v56   ;;  %1267 = vst [vmem:[#allocation4 + $0x40] sm:$0xff] %v1208_v57   ;;  %v436_v58 = vpop.f32.mrb[4].mxu0  ;;  %v516_v61 = vpop.f32.mrb[4].mxu1 }
 0x14c   :  { %v438_v62 = vpop.f32.mrb[5].mxu0  ;;  %v518_v18 = vpop.f32.mrb[5].mxu1  ;;  %v437_v60 = vadd.f32 %v436_v58, %v1857_v34  ;;  %v517_v0 = vadd.f32 %v516_v61, %v1857_v34 }
 0x14d   :  { %v440_v21 = vpop.f32.mrb[6].mxu0  ;;  %v520_v52 = vpop.f32.mrb[6].mxu1  ;;  %v439_v5 = vadd.f32 %v438_v62, %v1859_v39  ;;  %v519_v24 = vadd.f32 %v518_v18, %v1859_v39 }
 0x14e   :  { %v441_v3 = vadd.f32 %v440_v21, %v1857_v34  ;;  %v521_v9 = vadd.f32 %v520_v52, %v1857_v34  ;;  %v442_v11 = vpop.f32.mrb[7].mxu0  ;;  %v522_v16 = vpop.f32.mrb[7].mxu1 }
 0x14f   :  { %v443_v27 = vadd.f32 %v442_v11, %v1859_v39  ;;  %v523_v4 = vadd.f32 %v522_v16, %v1859_v39 }
 0x150   :  { %v1093_v17 = vpack.c.bf16 %v441_v3, %v437_v60  ;;  %v1133_v6 = vpack.c.bf16 %v521_v9, %v517_v0 }
 0x151   :  { %v1173_v19 = vpack.c.bf16 %v443_v27, %v439_v5  ;;  %v1213_v1 = vpack.c.bf16 %v523_v4, %v519_v24 }
 0x152   :  { %1245 = vst [vmem:[#allocation2 + $0x8] sm:$0xff] %v1093_v17   ;;  %1253 = vst [vmem:[#allocation2 + $0x48] sm:$0xff] %v1133_v6  }
 0x153   :  { %1260 = vst [vmem:[#allocation4 + $0x8] sm:$0xff] %v1173_v19   ;;  %1268 = vst [vmem:[#allocation4 + $0x48] sm:$0xff] %v1213_v1   ;;  %v446_v13 = vpop.f32.mrb[8].mxu0  ;;  %v526_v20 = vpop.f32.mrb[8].mxu1 }
 0x154   :  { %v448_v23 = vpop.f32.mrb[9].mxu0  ;;  %v528_v30 = vpop.f32.mrb[9].mxu1  ;;  %v447_v37 = vadd.f32 %v446_v13, %v1857_v34  ;;  %v527_v25 = vadd.f32 %v526_v20, %v1857_v34 }
 0x155   :  { %v450_v36 = vpop.f32.mrb[10].mxu0  ;;  %v530_v28 = vpop.f32.mrb[10].mxu1  ;;  %v449_v26 = vadd.f32 %v448_v23, %v1859_v39  ;;  %v529_v40 = vadd.f32 %v528_v30, %v1859_v39 }
 0x156   :  { %v451_v7 = vadd.f32 %v450_v36, %v1857_v34  ;;  %v531_v8 = vadd.f32 %v530_v28, %v1857_v34  ;;  %v452_v22 = vpop.f32.mrb[11].mxu0  ;;  %v532_v31 = vpop.f32.mrb[11].mxu1 }
 0x157   :  { %v453_v47 = vadd.f32 %v452_v22, %v1859_v39  ;;  %v533_v46 = vadd.f32 %v532_v31, %v1859_v39 }
 0x158   :  { %v1098_v29 = vpack.c.bf16 %v451_v7, %v447_v37  ;;  %v1138_v55 = vpack.c.bf16 %v531_v8, %v527_v25 }
 0x159   :  { %v1178_v50 = vpack.c.bf16 %v453_v47, %v449_v26  ;;  %v1218_v10 = vpack.c.bf16 %v533_v46, %v529_v40 }
 0x15a   :  { %1246 = vst [vmem:[#allocation2 + $0x10] sm:$0xff] %v1098_v29   ;;  %1254 = vst [vmem:[#allocation2 + $0x50] sm:$0xff] %v1138_v55  }
 0x15b   :  { %1261 = vst [vmem:[#allocation4 + $0x10] sm:$0xff] %v1178_v50   ;;  %1269 = vst [vmem:[#allocation4 + $0x50] sm:$0xff] %v1218_v10   ;;  %v456_v32 = vpop.f32.mrb[12].mxu0  ;;  %v536_v33 = vpop.f32.mrb[12].mxu1 }
 0x15c   :  { %v458_v2 = vpop.f32.mrb[13].mxu0  ;;  %v538_v35 = vpop.f32.mrb[13].mxu1  ;;  %v457_v59 = vadd.f32 %v456_v32, %v1857_v34  ;;  %v537_v42 = vadd.f32 %v536_v33, %v1857_v34 }
 0x15d   :  { %v460_v41 = vpop.f32.mrb[14].mxu0  ;;  %v540_v53 = vpop.f32.mrb[14].mxu1  ;;  %v459_v43 = vadd.f32 %v458_v2, %v1859_v39  ;;  %v539_v38 = vadd.f32 %v538_v35, %v1859_v39 }
 0x15e   :  { %v461_v12 = vadd.f32 %v460_v41, %v1857_v34  ;;  %v541_v15 = vadd.f32 %v540_v53, %v1857_v34  ;;  %v462_v63 = vpop.f32.mrb[15].mxu0  ;;  %v542_v14 = vpop.f32.mrb[15].mxu1 }
 0x15f   :  { %v463_v45 = vadd.f32 %v462_v63, %v1859_v39  ;;  %v543_v44 = vadd.f32 %v542_v14, %v1859_v39 }
 0x160   :  { %v1103_v48 = vpack.c.bf16 %v461_v12, %v457_v59  ;;  %v1143_v49 = vpack.c.bf16 %v541_v15, %v537_v42 }
 0x161   :  { %v1183_v51 = vpack.c.bf16 %v463_v45, %v459_v43  ;;  %v1223_v54 = vpack.c.bf16 %v543_v44, %v539_v38 }
 0x162   :  { %1247 = vst [vmem:[#allocation2 + $0x18] sm:$0xff] %v1103_v48   ;;  %1255 = vst [vmem:[#allocation2 + $0x58] sm:$0xff] %v1143_v49  }
 0x163   :  { %1262 = vst [vmem:[#allocation4 + $0x18] sm:$0xff] %v1183_v51   ;;  %1270 = vst [vmem:[#allocation4 + $0x58] sm:$0xff] %v1223_v54   ;;  %v466_v56 = vpop.f32.mrb[16].mxu0  ;;  %v546_v57 = vpop.f32.mrb[16].mxu1 }
 0x164   :  { %v468_v58 = vpop.f32.mrb[17].mxu0  ;;  %v548_v61 = vpop.f32.mrb[17].mxu1  ;;  %v467_v21 = vadd.f32 %v466_v56, %v1857_v34  ;;  %v547_v52 = vadd.f32 %v546_v57, %v1857_v34 }
 0x165   :  { %v470_v62 = vpop.f32.mrb[18].mxu0  ;;  %v550_v18 = vpop.f32.mrb[18].mxu1  ;;  %v469_v11 = vadd.f32 %v468_v58, %v1859_v39  ;;  %v549_v16 = vadd.f32 %v548_v61, %v1859_v39 }
 0x166   :  { %v471_v60 = vadd.f32 %v470_v62, %v1857_v34  ;;  %v551_v0 = vadd.f32 %v550_v18, %v1857_v34  ;;  %v472_v3 = vpop.f32.mrb[19].mxu0  ;;  %v552_v9 = vpop.f32.mrb[19].mxu1 }
 0x167   :  { %v473_v5 = vadd.f32 %v472_v3, %v1859_v39  ;;  %v553_v24 = vadd.f32 %v552_v9, %v1859_v39 }
 0x168   :  { %v1108_v27 = vpack.c.bf16 %v471_v60, %v467_v21  ;;  %v1148_v4 = vpack.c.bf16 %v551_v0, %v547_v52 }
 0x169   :  { %v1188_v17 = vpack.c.bf16 %v473_v5, %v469_v11  ;;  %v1228_v6 = vpack.c.bf16 %v553_v24, %v549_v16 }
 0x16a   :  { %1248 = vst [vmem:[#allocation2 + $0x20] sm:$0xff] %v1108_v27   ;;  %1256 = vst [vmem:[#allocation2 + $0x60] sm:$0xff] %v1148_v4  }
 0x16b   :  { %1263 = vst [vmem:[#allocation4 + $0x20] sm:$0xff] %v1188_v17   ;;  %1271 = vst [vmem:[#allocation4 + $0x60] sm:$0xff] %v1228_v6   ;;  %v476_v19 = vpop.f32.mrb[20].mxu0  ;;  %v556_v1 = vpop.f32.mrb[20].mxu1 }
 0x16c   :  { %v478_v13 = vpop.f32.mrb[21].mxu0  ;;  %v558_v20 = vpop.f32.mrb[21].mxu1  ;;  %v477_v36 = vadd.f32 %v476_v19, %v1857_v34  ;;  %v557_v28 = vadd.f32 %v556_v1, %v1857_v34 }
 0x16d   :  { %v480_v23 = vpop.f32.mrb[22].mxu0  ;;  %v560_v30 = vpop.f32.mrb[22].mxu1  ;;  %v479_v22 = vadd.f32 %v478_v13, %v1859_v39  ;;  %v559_v31 = vadd.f32 %v558_v20, %v1859_v39 }
 0x16e   :  { %v481_v37 = vadd.f32 %v480_v23, %v1857_v34  ;;  %v561_v25 = vadd.f32 %v560_v30, %v1857_v34  ;;  %v482_v7 = vpop.f32.mrb[23].mxu0  ;;  %v562_v8 = vpop.f32.mrb[23].mxu1 }
 0x16f   :  { %v483_v26 = vadd.f32 %v482_v7, %v1859_v39  ;;  %v563_v40 = vadd.f32 %v562_v8, %v1859_v39 }
 0x170   :  { %v1113_v47 = vpack.c.bf16 %v481_v37, %v477_v36  ;;  %v1153_v46 = vpack.c.bf16 %v561_v25, %v557_v28 }
 0x171   :  { %v1193_v29 = vpack.c.bf16 %v483_v26, %v479_v22  ;;  %v1233_v55 = vpack.c.bf16 %v563_v40, %v559_v31 }
 0x172   :  { %1249 = vst [vmem:[#allocation2 + $0x28] sm:$0xff] %v1113_v47   ;;  %1257 = vst [vmem:[#allocation2 + $0x68] sm:$0xff] %v1153_v46  }
 0x173   :  { %1264 = vst [vmem:[#allocation4 + $0x28] sm:$0xff] %v1193_v29   ;;  %1272 = vst [vmem:[#allocation4 + $0x68] sm:$0xff] %v1233_v55   ;;  %v486_v50 = vpop.f32.mrb[24].mxu0  ;;  %v566_v10 = vpop.f32.mrb[24].mxu1 }
 0x174   :  { %v488_v32 = vpop.f32.mrb[25].mxu0  ;;  %v568_v33 = vpop.f32.mrb[25].mxu1  ;;  %v487_v41 = vadd.f32 %v486_v50, %v1857_v34  ;;  %v567_v53 = vadd.f32 %v566_v10, %v1857_v34 }
 0x175   :  { %v490_v2 = vpop.f32.mrb[26].mxu0  ;;  %v570_v35 = vpop.f32.mrb[26].mxu1  ;;  %v489_v63 = vadd.f32 %v488_v32, %v1859_v39  ;;  %v569_v14 = vadd.f32 %v568_v33, %v1859_v39 }
 0x176   :  { %v491_v59 = vadd.f32 %v490_v2, %v1857_v34  ;;  %v571_v42 = vadd.f32 %v570_v35, %v1857_v34  ;;  %v492_v12 = vpop.f32.mrb[27].mxu0  ;;  %v572_v15 = vpop.f32.mrb[27].mxu1 }
 0x177   :  { %v493_v43 = vadd.f32 %v492_v12, %v1859_v39  ;;  %v573_v38 = vadd.f32 %v572_v15, %v1859_v39 }
 0x178   :  { %v1118_v45 = vpack.c.bf16 %v491_v59, %v487_v41  ;;  %v1158_v44 = vpack.c.bf16 %v571_v42, %v567_v53 }
 0x179   :  { %v1198_v48 = vpack.c.bf16 %v493_v43, %v489_v63  ;;  %v1238_v49 = vpack.c.bf16 %v573_v38, %v569_v14 }
 0x17a   :  { %1250 = vst [vmem:[#allocation2 + $0x30] sm:$0xff] %v1118_v45   ;;  %1258 = vst [vmem:[#allocation2 + $0x70] sm:$0xff] %v1158_v44  }
 0x17b   :  { %1265 = vst [vmem:[#allocation4 + $0x30] sm:$0xff] %v1198_v48   ;;  %1273 = vst [vmem:[#allocation4 + $0x70] sm:$0xff] %v1238_v49   ;;  %v496_v51 = vpop.f32.mrb[28].mxu0  ;;  %v576_v54 = vpop.f32.mrb[28].mxu1 }
 0x17c   :  { %v498_v56 = vpop.f32.mrb[29].mxu0  ;;  %v578_v57 = vpop.f32.mrb[29].mxu1  ;;  %v497_v62 = vadd.f32 %v496_v51, %v1857_v34  ;;  %v577_v18 = vadd.f32 %v576_v54, %v1857_v34 }
 0x17d   :  { %v500_v58 = vpop.f32.mrb[30].mxu0  ;;  %v580_v61 = vpop.f32.mrb[30].mxu1  ;;  %v499_v3 = vadd.f32 %v498_v56, %v1859_v39  ;;  %v579_v9 = vadd.f32 %v578_v57, %v1859_v39 }
 0x17e   :  { %v501_v21 = vadd.f32 %v500_v58, %v1857_v34  ;;  %v581_v52 = vadd.f32 %v580_v61, %v1857_v34  ;;  %v502_v60 = vpop.f32.mrb[31].mxu0  ;;  %v582_v0 = vpop.f32.mrb[31].mxu1 }
 0x17f   :  { %v503_v11 = vadd.f32 %v502_v60, %v1859_v39  ;;  %v583_v16 = vadd.f32 %v582_v0, %v1859_v39 }
 0x180   :  { %v1123_v5 = vpack.c.bf16 %v501_v21, %v497_v62  ;;  %v1163_v24 = vpack.c.bf16 %v581_v52, %v577_v18 }
 0x181   :  { %v1203_v27 = vpack.c.bf16 %v503_v11, %v499_v3  ;;  %v1243_v4 = vpack.c.bf16 %v583_v16, %v579_v9 }
 0x182   :  { %1251 = vst [vmem:[#allocation2 + $0x38] sm:$0xff] %v1123_v5   ;;  %1259 = vst [vmem:[#allocation2 + $0x78] sm:$0xff] %v1163_v24  }
 0x183   :  { %1266 = vst [vmem:[#allocation4 + $0x38] sm:$0xff] %v1203_v27   ;;  %1274 = vst [vmem:[#allocation4 + $0x78] sm:$0xff] %v1243_v4  }
 0x184   :  { %1303 = shalt.err (!%p1300_p4)
}
 0x185   :  { %s1304_s13 = scalar_lea.hbm %s1959_s3, 2048 }
 0x186   :  { %p1305_p5 = scmp.ne.s32.totalorder %s1959_s3, %s1304_s13  ;;  %p1308_p6 = scmp.lt.u32.totalorder %s1304_s13, %s1959_s3 }
 0x188   :  { %p1310_p7 = pnand %p1308_p6, %p1305_p5 }
 0x18a   :  { %1313 = shalt.err (!%p1310_p7)
}
 0x18b   :  { %s1343_s18 = smov 64   ;;  %s1344_s19 = smov 4  }
 0x18c   :  { %916 = dma.vmem_to_hbm [thread:$0]  %s911_s7, 2048, %s1959_s3, [#allocation3], %s1343_s18, %s1343_s18, %s1344_s19  }
 0x18d   :  { %s1314_s22 = scalar_lea.vmem %s1925_s9, 2048  ;;  %p1319_p9 = scmp.lt.s32.totalorder %s1925_s9, %s1925_s9 }
 0x18e   :  { %p1315_p8 = scmp.ne.s32.totalorder %s1925_s9, %s1314_s22  ;;  %p1320_p10 = scmp.lt.s32.totalorder %s1314_s22, %s1314_s22 }
 0x190   :  { %p1321_p11 = por %p1320_p10, %p1319_p9 }
 0x192   :  { %p1322_p12 = pnand %p1321_p11, %p1315_p8 }
 0x194   :  { %1325 = shalt.err (!%p1322_p12)
}
 0x195   :  { %s1326_s25 = scalar_lea.hbm %s1960_s4, 2048 }
 0x196   :  { %p1327_p13 = scmp.ne.s32.totalorder %s1960_s4, %s1326_s25  ;;  %p1330_p0 = scmp.lt.u32.totalorder %s1326_s25, %s1960_s4 }
 0x198   :  { %p1332_p1 = pnand %p1330_p0, %p1327_p13 }
 0x19a   :  { %1335 = shalt.err (!%p1332_p1)
}
 0x19b   :  { %928 = dma.vmem_to_hbm [thread:$0]  %s1925_s9, 2048, %s1960_s4, [#allocation5], %s1343_s18, %s1343_s18, %s1344_s19  }
 0x19c   :  { %1336 = dma.done.wait [#allocation3], 2048  }
 0x19d   :  { %1337 = vsyncadd [#allocation3], 4294965248 }
 0x19e   :  { %1338 = dma.done.wait [#allocation5], 2048  }
 0x19f   :  { %1339 = vsyncadd [#allocation5], 4294965248 }
 0x1a0   :  { %935 = vsyncpa [#allocation3], 1 }
 0x1a1   :  { %936 = vsyncpa [#allocation5], 1 }

</bundles_post_ra>
